<compile_context>
chip_gen: v5e
topology: v5e:2x2
jax: 0.10.0
libtpu: 0.0.40
codegen_flags: <defaults>
</compile_context>

<pallas_src>
import jax
import jax.numpy as jnp
from jax.experimental import pallas as pl
from jax.experimental.pallas import tpu as pltpu


def _round_up(v, m):
    return (v + m - 1) // m * m


# --------------------------------------------------------------------------
# Kernel: one fused forward step over a (tile_m, sim_dim) row-block.
# --------------------------------------------------------------------------
def _regulator_kernel(
    x_ref,            # (tm, sim_dim)    f32 (or input dtype)
    w1_ref,           # (sim_dim, h_cat) bf16  fused first-layer weight
    b1_ref,           # (1, h_cat)       f32
    w2m_ref,          # (h_cat, embed)   bf16  matrix-branch second layer
    b2m_ref,          # (1, embed)       f32
    w2s_ref,          # (1, h_cat)       f32   smooth-branch second layer (row)
    b2s_ref,          # (1, 1)           f32
    matrix_ref,       # (tm, embed)      residual
    smooth_ref,       # (tm, 1)          residual
    matrix_out_ref,   # (tm, embed)
    smooth_out_ref,   # (tm, 1)
):
    # fused first layer (both branches) on the MXU, f32 accumulation
    x = x_ref[...].astype(w1_ref.dtype)
    h = jnp.tanh(
        jnp.dot(x, w1_ref[...], preferred_element_type=jnp.float32) + b1_ref[...]
    )

    # matrix branch: second Linear on the MXU -> tanh -> +residual -> clamp
    m = jnp.dot(h.astype(w2m_ref.dtype), w2m_ref[...],
                preferred_element_type=jnp.float32) + b2m_ref[...]
    matrix_out_ref[...] = jnp.clip(
        jnp.tanh(m) + matrix_ref[...].astype(jnp.float32), -1.0, 1.0
    ).astype(matrix_out_ref.dtype)

    # smooth branch: output width 1 -> keep it off the MXU (VPU mul + XLU reduce)
    s = jnp.sum(h * w2s_ref[...], axis=-1, keepdims=True) + b2s_ref[...]
    smooth_out_ref[...] = jnp.maximum(
        s + smooth_ref[...].astype(jnp.float32), 0.0
    ).astype(smooth_out_ref.dtype)


# --------------------------------------------------------------------------
# One-time weight packing (hoisted out of the per-call path).
# --------------------------------------------------------------------------
def pack_params(params, *, mxu_dtype=jnp.bfloat16):
    (w1m, b1m, w2m, b2m, w1s, b1s, w2s, b2s) = params
    sim_dim, h_m = w1m.shape            # h_m = 2*sim_dim
    h_s = w1s.shape[1]                  # h_s = sim_dim // 2
    embed_dim = w2m.shape[1]
    h_cat = _round_up(h_m + h_s, 128)   # contiguous hidden packing

    f32 = jnp.float32
    w1c = jnp.zeros((sim_dim, h_cat), f32)
    w1c = w1c.at[:, :h_m].set(w1m.astype(f32))
    w1c = w1c.at[:, h_m:h_m + h_s].set(w1s.astype(f32))
    b1c = jnp.zeros((1, h_cat), f32)
    b1c = b1c.at[:, :h_m].set(b1m.reshape(1, -1).astype(f32))
    b1c = b1c.at[:, h_m:h_m + h_s].set(b1s.reshape(1, -1).astype(f32))

    # matrix branch: zero rows beyond h_m contribute nothing
    w2c = jnp.zeros((h_cat, embed_dim), f32)
    w2c = w2c.at[:h_m, :].set(w2m.astype(f32))
    b2m_row = b2m.reshape(1, embed_dim).astype(f32)

    # smooth branch as a broadcastable row vector + scalar bias
    w2s_row = jnp.zeros((1, h_cat), f32)
    w2s_row = w2s_row.at[:, h_m:h_m + h_s].set(w2s.reshape(1, -1).astype(f32))
    b2s_sc = b2s.reshape(1, 1).astype(f32)

    return {
        "w1c": w1c.astype(mxu_dtype), "b1c": b1c,
        "w2c": w2c.astype(mxu_dtype), "b2m": b2m_row,
        "w2s": w2s_row, "b2s": b2s_sc,
        "sim_dim": sim_dim, "embed_dim": embed_dim, "h_cat": h_cat,
    }


# --------------------------------------------------------------------------
# Generation-aware limits.
# --------------------------------------------------------------------------
def _tpu_limits():
    vmem_cap = 64 * 2 ** 20           # conservative default (v7x per-core VMEM)
    n_cores = 1
    try:
        info = pltpu.get_tpu_info()
        cap = getattr(info, "vmem_capacity_bytes", None)
        if cap:
            vmem_cap = int(cap)
        for name in ("num_cores", "core_count", "num_tensorcores",
                     "tensorcores_per_chip"):
            v = getattr(info, name, None)
            if isinstance(v, int) and v > 0:
                n_cores = v
                break
    except Exception:
        pass
    return vmem_cap, n_cores


# --------------------------------------------------------------------------
# Wrapper
# --------------------------------------------------------------------------
def correspondence_regulator(x, matrix, smooth, packed, *, tile_m=512):
    """x: (B,N,sim_dim); matrix: (B,N,embed_dim); smooth: (B,N,1)."""
    B, N, sim_dim = x.shape
    embed_dim = matrix.shape[-1]
    assert packed["sim_dim"] == sim_dim and packed["embed_dim"] == embed_dim
    M = B * N
    h_cat = packed["h_cat"]

    # reshapes only -- no pad / cast copies in the wrapper
    x2 = x.reshape(M, sim_dim)
    matrix2 = matrix.reshape(M, embed_dim)
    smooth2 = smooth.reshape(M, 1)

    vmem_cap, n_cores = _tpu_limits()
    tile_budget = min(int(0.60 * vmem_cap), 96 * 2 ** 20)
    vmem_limit = min(int(0.75 * vmem_cap), 112 * 2 ** 20)

    lane = 128
    sim_v = _round_up(sim_dim, lane)
    emb_v = _round_up(embed_dim, lane)
    wdt = jnp.dtype(packed["w1c"].dtype).itemsize
    w_bytes = (wdt * (_round_up(sim_dim, 8) * h_cat + h_cat * emb_v)
               + 4 * 8 * (2 * h_cat + emb_v + lane))

    def _vmem_bytes(tm, w_buf):
        per_in = 4 * tm * (sim_v + emb_v + lane)        # x, matrix, smooth blocks
        per_out = 4 * tm * (emb_v + lane)
        inter = tm * (4 * h_cat + wdt * h_cat + wdt * sim_v + 4 * emb_v)
        return 2 * (per_in + per_out) + w_buf * w_bytes + inter + (2 << 20)

    def _choose_tile(w_buf):
        if M < 8:
            return M                                     # full-extent block
        tm = min(_round_up(tile_m, 8), (M // 8) * 8)     # never exceed the array
        # give every TensorCore at least one grid step (v7x has 2 TCs)
        if n_cores > 1 and M >= 16 and pl.cdiv(M, tm) < n_cores:
            tm = min(tm, max(8, _round_up(pl.cdiv(M, n_cores), 8)))
        while tm > 8 and _vmem_bytes(tm, w_buf) > tile_budget:
            tm = max(8, _round_up(tm // 2, 8))
        return tm

    out_shape = (
        jax.ShapeDtypeStruct((M, embed_dim), matrix.dtype),
        jax.ShapeDtypeStruct((M, 1), smooth.dtype),
    )
    args = (x2, packed["w1c"], packed["b1c"], packed["w2c"], packed["b2m"],
            packed["w2s"], packed["b2s"], matrix2, smooth2)

    def _run(single_buffer_weights):
        tm = _choose_tile(1 if single_buffer_weights else 2)
        grid = (pl.cdiv(M, tm),)

        def const_spec(shape):
            imap = lambda i: (0,) * len(shape)
            if single_buffer_weights:
                return pl.BlockSpec(shape, imap, pipeline_mode=pl.Buffered(1))
            return pl.BlockSpec(shape, imap)

        in_specs = [
            pl.BlockSpec((tm, sim_dim), lambda i: (i, 0)),     # x
            const_spec((sim_dim, h_cat)),                      # W1 (fused)
            const_spec((1, h_cat)),                            # b1 (fused)
            const_spec((h_cat, embed_dim)),                    # W2 matrix branch
            const_spec((1, embed_dim)),                        # b2 matrix branch
            const_spec((1, h_cat)),                            # w2 smooth (row)
            const_spec((1, 1)),                                # b2 smooth
            pl.BlockSpec((tm, embed_dim), lambda i: (i, 0)),   # matrix residual
            pl.BlockSpec((tm, 1), lambda i: (i, 0)),           # smooth residual
        ]
        out_specs = [
            pl.BlockSpec((tm, embed_dim), lambda i: (i, 0)),
            pl.BlockSpec((tm, 1), lambda i: (i, 0)),
        ]
        return pl.pallas_call(
            _regulator_kernel,
            out_shape=out_shape,
            grid_spec=pltpu.PrefetchScalarGridSpec(
                num_scalar_prefetch=0,
                grid=grid,
                in_specs=in_specs,
                out_specs=out_specs,
            ),
            compiler_params=pltpu.CompilerParams(
                dimension_semantics=("parallel",),
                vmem_limit_bytes=vmem_limit,
            ),
            # residuals are read once and fully overwritten -> reuse buffers
            input_output_aliases={7: 0, 8: 1},
        )(*args)

    try:
        matrix_out, smooth_out = _run(True)
    except Exception:
        # single-buffered pipeline_mode unsupported on this jax build -> default
        matrix_out, smooth_out = _run(False)

    return (matrix_out.reshape(B, N, embed_dim),
            smooth_out.reshape(B, N, 1))


# --------------------------------------------------------------------------
# Parameter init + pure-JAX reference (unfused, f32) for correctness checking
# --------------------------------------------------------------------------
def init_params(key, sim_dim, embed_dim):
    """Deterministic synthetic init. Weights stored as (in_dim, out_dim)."""
    ks = jax.random.split(key, 8)
    h_m = sim_dim * 2
    h_s = sim_dim // 2
    scale = 0.1
    w1m = scale * jax.random.normal(ks[0], (sim_dim, h_m), jnp.float32)
    b1m = scale * jax.random.normal(ks[1], (1, h_m), jnp.float32)
    w2m = scale * jax.random.normal(ks[2], (h_m, embed_dim), jnp.float32)
    b2m = scale * jax.random.normal(ks[3], (1, embed_dim), jnp.float32)
    w1s = scale * jax.random.normal(ks[4], (sim_dim, h_s), jnp.float32)
    b1s = scale * jax.random.normal(ks[5], (1, h_s), jnp.float32)
    w2s = scale * jax.random.normal(ks[6], (h_s, 1), jnp.float32)
    b2s = scale * jax.random.normal(ks[7], (1, 1), jnp.float32)
    return (w1m, b1m, w2m, b2m, w1s, b1s, w2s, b2s)


def reference(x, matrix, smooth, params):
    (w1m, b1m, w2m, b2m, w1s, b1s, w2s, b2s) = params
    m = jnp.tanh(jnp.tanh(x @ w1m + b1m) @ w2m + b2m)
    matrix_out = jnp.clip(m + matrix, -1.0, 1.0)
    s = jnp.tanh(x @ w1s + b1s) @ w2s + b2s
    smooth_out = jnp.maximum(s + smooth, 0.0)
    return matrix_out, smooth_out


if __name__ == "__main__":
    B, N = 2, 8
    sim_dim, embed_dim = 32, 32

    key = jax.random.PRNGKey(0)
    k_x, k_m, k_s, k_p = jax.random.split(key, 4)

    x = jax.random.normal(k_x, (B, N, sim_dim), jnp.float32)
    matrix = 0.5 * jax.random.normal(k_m, (B, N, embed_dim), jnp.float32)
    smooth = jax.random.normal(k_s, (B, N, 1), jnp.float32)

    params = init_params(k_p, sim_dim, embed_dim)
    packed = pack_params(params)          # hoisted one-time packing

    matrix_out, smooth_out = correspondence_regulator(x, matrix, smooth, packed)
    jax.block_until_ready((matrix_out, smooth_out))

    # bf16 MXU inputs with f32 accumulation -> relaxed tolerance vs f32 reference
    ref_m, ref_s = reference(x, matrix, smooth, params)
    assert jnp.allclose(matrix_out, ref_m, rtol=3e-2, atol=3e-2), \
        float(jnp.max(jnp.abs(matrix_out - ref_m)))
    assert jnp.allclose(smooth_out, ref_s, rtol=3e-2, atol=3e-2), \
        float(jnp.max(jnp.abs(smooth_out - ref_s)))

    print("KERNEL_OK")
</pallas_src>

<mosaic_0001>
module attributes {stable_mosaic.version = 11 : i64} {
  func.func @_regulator_kernel(%arg0: i32, %arg1: memref<16x32xf32, #tpu.memory_space<vmem>>, %arg2: memref<32x128xbf16, #tpu.memory_space<vmem>>, %arg3: memref<1x128xf32, #tpu.memory_space<vmem>>, %arg4: memref<128x32xbf16, #tpu.memory_space<vmem>>, %arg5: memref<1x32xf32, #tpu.memory_space<vmem>>, %arg6: memref<1x128xf32, #tpu.memory_space<vmem>>, %arg7: memref<1x1xf32, #tpu.memory_space<vmem>>, %arg8: memref<16x32xf32, #tpu.memory_space<vmem>>, %arg9: memref<16x1xf32, #tpu.memory_space<vmem>>, %arg10: memref<16x32xf32, #tpu.memory_space<vmem>>, %arg11: memref<16x1xf32, #tpu.memory_space<vmem>>) attributes {dimension_semantics = [#tpu.dimension_semantics<parallel>], iteration_bounds = array<i64: 1>, scalar_prefetch = 0 : i64, scratch_operands = 0 : i64, tpu.core_type = #tpu.core_type<tc>, window_params = [{transform_indices = @transform_0, window_bounds = array<i64: 16, 32>}, {pipeline_mode = #tpu.pipeline_mode<synchronous>, transform_indices = @transform_1, window_bounds = array<i64: 32, 128>}, {pipeline_mode = #tpu.pipeline_mode<synchronous>, transform_indices = @transform_2, window_bounds = array<i64: 1, 128>}, {pipeline_mode = #tpu.pipeline_mode<synchronous>, transform_indices = @transform_3, window_bounds = array<i64: 128, 32>}, {pipeline_mode = #tpu.pipeline_mode<synchronous>, transform_indices = @transform_4, window_bounds = array<i64: 1, 32>}, {pipeline_mode = #tpu.pipeline_mode<synchronous>, transform_indices = @transform_5, window_bounds = array<i64: 1, 128>}, {pipeline_mode = #tpu.pipeline_mode<synchronous>, transform_indices = @transform_6, window_bounds = array<i64: 1, 1>}, {transform_indices = @transform_7, window_bounds = array<i64: 16, 32>}, {transform_indices = @transform_8, window_bounds = array<i64: 16, 1>}, {transform_indices = @transform_9, window_bounds = array<i64: 16, 32>}, {transform_indices = @transform_10, window_bounds = array<i64: 16, 1>}]} {
    %c0 = arith.constant 0 : index
    %c0_0 = arith.constant 0 : index
    %0 = vector.load %arg1[%c0, %c0_0] : memref<16x32xf32, #tpu.memory_space<vmem>>, vector<16x32xf32>
    %1 = arith.truncf %0 : vector<16x32xf32> to vector<16x32xbf16>
    %c0_1 = arith.constant 0 : index
    %c0_2 = arith.constant 0 : index
    %2 = vector.load %arg2[%c0_1, %c0_2] : memref<32x128xbf16, #tpu.memory_space<vmem>>, vector<32x128xbf16>
    %cst = arith.constant dense<0.000000e+00> : vector<16x128xf32>
    %3 = tpu.matmul %1, %2, %cst {dimension_numbers = #tpu.dot_dimension_numbers<[1], [0], [0], [1], [0, 0, 1, 1], [], []>} : vector<16x32xbf16>, vector<32x128xbf16>, vector<16x128xf32> -> vector<16x128xf32>
    %c0_3 = arith.constant 0 : index
    %c0_4 = arith.constant 0 : index
    %4 = vector.load %arg3[%c0_3, %c0_4] : memref<1x128xf32, #tpu.memory_space<vmem>>, vector<1x128xf32>
    %5 = vector.broadcast %4 : vector<1x128xf32> to vector<16x128xf32>
    %6 = arith.addf %3, %5 : vector<16x128xf32>
    %7 = math.tanh %6 : vector<16x128xf32>
    %8 = arith.truncf %7 : vector<16x128xf32> to vector<16x128xbf16>
    %c0_5 = arith.constant 0 : index
    %c0_6 = arith.constant 0 : index
    %9 = vector.load %arg4[%c0_5, %c0_6] : memref<128x32xbf16, #tpu.memory_space<vmem>>, vector<128x32xbf16>
    %cst_7 = arith.constant dense<0.000000e+00> : vector<16x32xf32>
    %10 = tpu.matmul %8, %9, %cst_7 {dimension_numbers = #tpu.dot_dimension_numbers<[1], [0], [0], [1], [0, 0, 1, 1], [], []>} : vector<16x128xbf16>, vector<128x32xbf16>, vector<16x32xf32> -> vector<16x32xf32>
    %c0_8 = arith.constant 0 : index
    %c0_9 = arith.constant 0 : index
    %11 = vector.load %arg5[%c0_8, %c0_9] : memref<1x32xf32, #tpu.memory_space<vmem>>, vector<1x32xf32>
    %12 = vector.broadcast %11 : vector<1x32xf32> to vector<16x32xf32>
    %13 = arith.addf %10, %12 : vector<16x32xf32>
    %14 = math.tanh %13 : vector<16x32xf32>
    %c0_10 = arith.constant 0 : index
    %c0_11 = arith.constant 0 : index
    %15 = vector.load %arg8[%c0_10, %c0_11] : memref<16x32xf32, #tpu.memory_space<vmem>>, vector<16x32xf32>
    %16 = arith.addf %14, %15 : vector<16x32xf32>
    %cst_12 = arith.constant -1.000000e+00 : f32
    %cst_13 = arith.constant 1.000000e+00 : f32
    %17 = vector.broadcast %cst_12 : f32 to vector<16x32xf32>
    %18 = arith.maximumf %17, %16 : vector<16x32xf32>
    %19 = vector.broadcast %cst_13 : f32 to vector<16x32xf32>
    %20 = arith.minimumf %19, %18 : vector<16x32xf32>
    %c0_14 = arith.constant 0 : index
    %c0_15 = arith.constant 0 : index
    %21 = vector.load %arg10[%c0_14, %c0_15] : memref<16x32xf32, #tpu.memory_space<vmem>>, vector<16x32xf32>
    tpu.vector_store %arg10[%c0_14, %c0_15], %20 {strides = array<i32>} : memref<16x32xf32, #tpu.memory_space<vmem>>, vector<16x32xf32>,
    %c0_16 = arith.constant 0 : index
    %c0_17 = arith.constant 0 : index
    %22 = vector.load %arg6[%c0_16, %c0_17] : memref<1x128xf32, #tpu.memory_space<vmem>>, vector<1x128xf32>
    %23 = vector.broadcast %22 : vector<1x128xf32> to vector<16x128xf32>
    %24 = arith.mulf %7, %23 : vector<16x128xf32>
    %cst_18 = arith.constant dense<0.000000e+00> : vector<16xf32>
    %25 = vector.multi_reduction <add>, %24, %cst_18 [1] : vector<16x128xf32> to vector<16xf32>
    %26 = vector.shape_cast %25 : vector<16xf32> to vector<16x1xf32>
    %c0_19 = arith.constant 0 : index
    %c0_20 = arith.constant 0 : index
    %27 = vector.load %arg7[%c0_19, %c0_20] : memref<1x1xf32, #tpu.memory_space<vmem>>, vector<1x1xf32>
    %28 = vector.broadcast %27 : vector<1x1xf32> to vector<16x1xf32>
    %29 = arith.addf %26, %28 : vector<16x1xf32>
    %c0_21 = arith.constant 0 : index
    %c0_22 = arith.constant 0 : index
    %30 = vector.load %arg9[%c0_21, %c0_22] : memref<16x1xf32, #tpu.memory_space<vmem>>, vector<16x1xf32>
    %31 = arith.addf %29, %30 : vector<16x1xf32>
    %cst_23 = arith.constant 0.000000e+00 : f32
    %32 = vector.broadcast %cst_23 : f32 to vector<16x1xf32>
    %33 = arith.maximumf %31, %32 : vector<16x1xf32>
    %c0_24 = arith.constant 0 : index
    %c0_25 = arith.constant 0 : index
    %34 = vector.load %arg11[%c0_24, %c0_25] : memref<16x1xf32, #tpu.memory_space<vmem>>, vector<16x1xf32>
    tpu.vector_store %arg11[%c0_24, %c0_25], %33 {strides = array<i32>} : memref<16x1xf32, #tpu.memory_space<vmem>>, vector<16x1xf32>,
    return
  }
  func.func @transform_0(%arg0: i32) -> (i32, i32) {
    %c0_i32 = arith.constant 0 : i32
    %c0_i32_0 = arith.constant 0 : i32
    return %arg0, %c0_i32 : i32, i32
  }
  func.func @transform_1(%arg0: i32) -> (i32, i32) {
    %c0_i32 = arith.constant 0 : i32
    %c0_i32_0 = arith.constant 0 : i32
    %c0_i32_1 = arith.constant 0 : i32
    return %c0_i32, %c0_i32_0 : i32, i32
  }
  func.func @transform_2(%arg0: i32) -> (i32, i32) {
    %c0_i32 = arith.constant 0 : i32
    %c0_i32_0 = arith.constant 0 : i32
    %c0_i32_1 = arith.constant 0 : i32
    return %c0_i32, %c0_i32_0 : i32, i32
  }
  func.func @transform_3(%arg0: i32) -> (i32, i32) {
    %c0_i32 = arith.constant 0 : i32
    %c0_i32_0 = arith.constant 0 : i32
    %c0_i32_1 = arith.constant 0 : i32
    return %c0_i32, %c0_i32_0 : i32, i32
  }
  func.func @transform_4(%arg0: i32) -> (i32, i32) {
    %c0_i32 = arith.constant 0 : i32
    %c0_i32_0 = arith.constant 0 : i32
    %c0_i32_1 = arith.constant 0 : i32
    return %c0_i32, %c0_i32_0 : i32, i32
  }
  func.func @transform_5(%arg0: i32) -> (i32, i32) {
    %c0_i32 = arith.constant 0 : i32
    %c0_i32_0 = arith.constant 0 : i32
    %c0_i32_1 = arith.constant 0 : i32
    return %c0_i32, %c0_i32_0 : i32, i32
  }
  func.func @transform_6(%arg0: i32) -> (i32, i32) {
    %c0_i32 = arith.constant 0 : i32
    %c0_i32_0 = arith.constant 0 : i32
    %c0_i32_1 = arith.constant 0 : i32
    return %c0_i32, %c0_i32_0 : i32, i32
  }
  func.func @transform_7(%arg0: i32) -> (i32, i32) {
    %c0_i32 = arith.constant 0 : i32
    %c0_i32_0 = arith.constant 0 : i32
    return %arg0, %c0_i32 : i32, i32
  }
  func.func @transform_8(%arg0: i32) -> (i32, i32) {
    %c0_i32 = arith.constant 0 : i32
    %c0_i32_0 = arith.constant 0 : i32
    return %arg0, %c0_i32 : i32, i32
  }
  func.func @transform_9(%arg0: i32) -> (i32, i32) {
    %c0_i32 = arith.constant 0 : i32
    %c0_i32_0 = arith.constant 0 : i32
    return %arg0, %c0_i32 : i32, i32
  }
  func.func @transform_10(%arg0: i32) -> (i32, i32) {
    %c0_i32 = arith.constant 0 : i32
    %c0_i32_0 = arith.constant 0 : i32
    return %arg0, %c0_i32 : i32, i32
  }
}

module attributes {stable_mosaic.version = 11 : i64} {
  func.func @_regulator_kernel(%arg0: i32, %arg1: memref<16x32xf32, #tpu.memory_space<vmem>>, %arg2: memref<32x128xbf16, #tpu.memory_space<vmem>>, %arg3: memref<1x128xf32, #tpu.memory_space<vmem>>, %arg4: memref<128x32xbf16, #tpu.memory_space<vmem>>, %arg5: memref<1x32xf32, #tpu.memory_space<vmem>>, %arg6: memref<1x128xf32, #tpu.memory_space<vmem>>, %arg7: memref<1x1xf32, #tpu.memory_space<vmem>>, %arg8: memref<16x32xf32, #tpu.memory_space<vmem>>, %arg9: memref<16x1xf32, #tpu.memory_space<vmem>>, %arg10: memref<16x32xf32, #tpu.memory_space<vmem>>, %arg11: memref<16x1xf32, #tpu.memory_space<vmem>>) attributes {dimension_semantics = [#tpu.dimension_semantics<parallel>], iteration_bounds = array<i64: 1>, scalar_prefetch = 0 : i64, scratch_operands = 0 : i64, tpu.core_type = #tpu.core_type<tc>, window_params = [{transform_indices = @transform_0, window_bounds = array<i64: 16, 32>}, {pipeline_mode = #tpu.pipeline_mode<synchronous>, transform_indices = @transform_1, window_bounds = array<i64: 32, 128>}, {pipeline_mode = #tpu.pipeline_mode<synchronous>, transform_indices = @transform_2, window_bounds = array<i64: 1, 128>}, {pipeline_mode = #tpu.pipeline_mode<synchronous>, transform_indices = @transform_3, window_bounds = array<i64: 128, 32>}, {pipeline_mode = #tpu.pipeline_mode<synchronous>, transform_indices = @transform_4, window_bounds = array<i64: 1, 32>}, {pipeline_mode = #tpu.pipeline_mode<synchronous>, transform_indices = @transform_5, window_bounds = array<i64: 1, 128>}, {pipeline_mode = #tpu.pipeline_mode<synchronous>, transform_indices = @transform_6, window_bounds = array<i64: 1, 1>}, {transform_indices = @transform_7, window_bounds = array<i64: 16, 32>}, {transform_indices = @transform_8, window_bounds = array<i64: 16, 1>}, {transform_indices = @transform_9, window_bounds = array<i64: 16, 32>}, {transform_indices = @transform_10, window_bounds = array<i64: 16, 1>}]} {
    %c0 = arith.constant 0 : index
    %c0_0 = arith.constant 0 : index
    %0 = vector.load %arg1[%c0, %c0_0] : memref<16x32xf32, #tpu.memory_space<vmem>>, vector<16x32xf32>
    %1 = arith.truncf %0 : vector<16x32xf32> to vector<16x32xbf16>
    %c0_1 = arith.constant 0 : index
    %c0_2 = arith.constant 0 : index
    %2 = vector.load %arg2[%c0_1, %c0_2] : memref<32x128xbf16, #tpu.memory_space<vmem>>, vector<32x128xbf16>
    %cst = arith.constant dense<0.000000e+00> : vector<16x128xf32>
    %3 = tpu.matmul %1, %2, %cst {dimension_numbers = #tpu.dot_dimension_numbers<[1], [0], [0], [1], [0, 0, 1, 1], [], []>} : vector<16x32xbf16>, vector<32x128xbf16>, vector<16x128xf32> -> vector<16x128xf32>
    %c0_3 = arith.constant 0 : index
    %c0_4 = arith.constant 0 : index
    %4 = vector.load %arg3[%c0_3, %c0_4] : memref<1x128xf32, #tpu.memory_space<vmem>>, vector<1x128xf32>
    %5 = vector.broadcast %4 : vector<1x128xf32> to vector<16x128xf32>
    %6 = arith.addf %3, %5 : vector<16x128xf32>
    %7 = math.tanh %6 : vector<16x128xf32>
    %8 = arith.truncf %7 : vector<16x128xf32> to vector<16x128xbf16>
    %c0_5 = arith.constant 0 : index
    %c0_6 = arith.constant 0 : index
    %9 = vector.load %arg4[%c0_5, %c0_6] : memref<128x32xbf16, #tpu.memory_space<vmem>>, vector<128x32xbf16>
    %cst_7 = arith.constant dense<0.000000e+00> : vector<16x32xf32>
    %10 = tpu.matmul %8, %9, %cst_7 {dimension_numbers = #tpu.dot_dimension_numbers<[1], [0], [0], [1], [0, 0, 1, 1], [], []>} : vector<16x128xbf16>, vector<128x32xbf16>, vector<16x32xf32> -> vector<16x32xf32>
    %c0_8 = arith.constant 0 : index
    %c0_9 = arith.constant 0 : index
    %11 = vector.load %arg5[%c0_8, %c0_9] : memref<1x32xf32, #tpu.memory_space<vmem>>, vector<1x32xf32>
    %12 = vector.broadcast %11 : vector<1x32xf32> to vector<16x32xf32>
    %13 = arith.addf %10, %12 : vector<16x32xf32>
    %14 = math.tanh %13 : vector<16x32xf32>
    %c0_10 = arith.constant 0 : index
    %c0_11 = arith.constant 0 : index
    %15 = vector.load %arg8[%c0_10, %c0_11] : memref<16x32xf32, #tpu.memory_space<vmem>>, vector<16x32xf32>
    %16 = arith.addf %14, %15 : vector<16x32xf32>
    %cst_12 = arith.constant -1.000000e+00 : f32
    %cst_13 = arith.constant 1.000000e+00 : f32
    %17 = vector.broadcast %cst_12 : f32 to vector<16x32xf32>
    %18 = arith.maximumf %17, %16 : vector<16x32xf32>
    %19 = vector.broadcast %cst_13 : f32 to vector<16x32xf32>
    %20 = arith.minimumf %19, %18 : vector<16x32xf32>
    %c0_14 = arith.constant 0 : index
    %c0_15 = arith.constant 0 : index
    %21 = vector.load %arg10[%c0_14, %c0_15] : memref<16x32xf32, #tpu.memory_space<vmem>>, vector<16x32xf32>
    tpu.vector_store %arg10[%c0_14, %c0_15], %20 {strides = array<i32>} : memref<16x32xf32, #tpu.memory_space<vmem>>, vector<16x32xf32>,
    %c0_16 = arith.constant 0 : index
    %c0_17 = arith.constant 0 : index
    %22 = vector.load %arg6[%c0_16, %c0_17] : memref<1x128xf32, #tpu.memory_space<vmem>>, vector<1x128xf32>
    %23 = vector.broadcast %22 : vector<1x128xf32> to vector<16x128xf32>
    %24 = arith.mulf %7, %23 : vector<16x128xf32>
    %cst_18 = arith.constant dense<0.000000e+00> : vector<16xf32>
    %25 = vector.multi_reduction <add>, %24, %cst_18 [1] : vector<16x128xf32> to vector<16xf32>
    %26 = vector.shape_cast %25 : vector<16xf32> to vector<16x1xf32>
    %c0_19 = arith.constant 0 : index
    %c0_20 = arith.constant 0 : index
    %27 = vector.load %arg7[%c0_19, %c0_20] : memref<1x1xf32, #tpu.memory_space<vmem>>, vector<1x1xf32>
    %28 = vector.broadcast %27 : vector<1x1xf32> to vector<16x1xf32>
    %29 = arith.addf %26, %28 : vector<16x1xf32>
    %c0_21 = arith.constant 0 : index
    %c0_22 = arith.constant 0 : index
    %30 = vector.load %arg9[%c0_21, %c0_22] : memref<16x1xf32, #tpu.memory_space<vmem>>, vector<16x1xf32>
    %31 = arith.addf %29, %30 : vector<16x1xf32>
    %cst_23 = arith.constant 0.000000e+00 : f32
    %32 = vector.broadcast %cst_23 : f32 to vector<16x1xf32>
    %33 = arith.maximumf %31, %32 : vector<16x1xf32>
    %c0_24 = arith.constant 0 : index
    %c0_25 = arith.constant 0 : index
    %34 = vector.load %arg11[%c0_24, %c0_25] : memref<16x1xf32, #tpu.memory_space<vmem>>, vector<16x1xf32>
    tpu.vector_store %arg11[%c0_24, %c0_25], %33 {strides = array<i32>} : memref<16x1xf32, #tpu.memory_space<vmem>>, vector<16x1xf32>,
    return
  }
  func.func @transform_0(%arg0: i32) -> (i32, i32) {
    %c0_i32 = arith.constant 0 : i32
    %c0_i32_0 = arith.constant 0 : i32
    return %arg0, %c0_i32 : i32, i32
  }
  func.func @transform_1(%arg0: i32) -> (i32, i32) {
    %c0_i32 = arith.constant 0 : i32
    %c0_i32_0 = arith.constant 0 : i32
    %c0_i32_1 = arith.constant 0 : i32
    return %c0_i32, %c0_i32_0 : i32, i32
  }
  func.func @transform_2(%arg0: i32) -> (i32, i32) {
    %c0_i32 = arith.constant 0 : i32
    %c0_i32_0 = arith.constant 0 : i32
    %c0_i32_1 = arith.constant 0 : i32
    return %c0_i32, %c0_i32_0 : i32, i32
  }
  func.func @transform_3(%arg0: i32) -> (i32, i32) {
    %c0_i32 = arith.constant 0 : i32
    %c0_i32_0 = arith.constant 0 : i32
    %c0_i32_1 = arith.constant 0 : i32
    return %c0_i32, %c0_i32_0 : i32, i32
  }
  func.func @transform_4(%arg0: i32) -> (i32, i32) {
    %c0_i32 = arith.constant 0 : i32
    %c0_i32_0 = arith.constant 0 : i32
    %c0_i32_1 = arith.constant 0 : i32
    return %c0_i32, %c0_i32_0 : i32, i32
  }
  func.func @transform_5(%arg0: i32) -> (i32, i32) {
    %c0_i32 = arith.constant 0 : i32
    %c0_i32_0 = arith.constant 0 : i32
    %c0_i32_1 = arith.constant 0 : i32
    return %c0_i32, %c0_i32_0 : i32, i32
  }
  func.func @transform_6(%arg0: i32) -> (i32, i32) {
    %c0_i32 = arith.constant 0 : i32
    %c0_i32_0 = arith.constant 0 : i32
    %c0_i32_1 = arith.constant 0 : i32
    return %c0_i32, %c0_i32_0 : i32, i32
  }
  func.func @transform_7(%arg0: i32) -> (i32, i32) {
    %c0_i32 = arith.constant 0 : i32
    %c0_i32_0 = arith.constant 0 : i32
    return %arg0, %c0_i32 : i32, i32
  }
  func.func @transform_8(%arg0: i32) -> (i32, i32) {
    %c0_i32 = arith.constant 0 : i32
    %c0_i32_0 = arith.constant 0 : i32
    return %arg0, %c0_i32 : i32, i32
  }
  func.func @transform_9(%arg0: i32) -> (i32, i32) {
    %c0_i32 = arith.constant 0 : i32
    %c0_i32_0 = arith.constant 0 : i32
    return %arg0, %c0_i32 : i32, i32
  }
  func.func @transform_10(%arg0: i32) -> (i32, i32) {
    %c0_i32 = arith.constant 0 : i32
    %c0_i32_0 = arith.constant 0 : i32
    return %arg0, %c0_i32 : i32, i32
  }
}

</mosaic_0001>

<bundles_post_ra>
// kernel: tpu_custom_call.1
= control target key start
LH: loop header
LB: loop body
LE: loop exit
PB: predicated region body
PF: predicated region fallthrough
CT: control target
= control target key end

     0   :  { %vm60_vm0 = vcmask 261120   ;;  %vm197_vm1 = vcmask 7168   ;;  %s403_s1 = inlined_call_operand.vmem [shape: bf16[32,128], index: 1, kind: input, shape index: {}]   ;;  %s404_s0 = inlined_call_operand.vmem [shape: f32[16,32], index: 0, kind: input, shape index: {}]   ;;  %s405_s3 = inlined_call_operand.vmem [shape: bf16[128,32], index: 3, kind: input, shape index: {}]   ;;  %s406_s2 = inlined_call_operand.vmem [shape: f32[1,128], index: 2, kind: input, shape index: {}]   ;;  %s407_s5 = inlined_call_operand.vmem [shape: f32[1,128], index: 5, kind: input, shape index: {}]   ;;  %s408_s6 = inlined_call_operand.<no memory space> [shape: f32[1,1], index: 6, kind: input, shape index: {}]   ;;  %s409_s4 = inlined_call_operand.vmem [shape: f32[1,32], index: 4, kind: input, shape index: {}]   ;;  %s410_s8 = inlined_call_operand.vmem [shape: f32[16,1], index: 8, kind: input, shape index: {}, may-alias: {8,10}]   ;;  %s411_s10 = inlined_call_operand.vmem [shape: f32[16,1], index: 10, kind: output, shape index: {1}, may-alias: {8,10}]   ;;  %s412_s7 = inlined_call_operand.vmem [shape: f32[16,32], index: 7, kind: input, shape index: {}, may-alias: {7,9}]   ;;  %s413_s9 = inlined_call_operand.vmem [shape: f32[16,32], index: 9, kind: output, shape index: {0}, may-alias: {7,9}]  }
   0x1   :  { %v252_v0 = vld [vmem:[%s403_s1 + $0x8] sm:$0xff]  ;;  %v251_v1 = vld [vmem:[%s403_s1] sm:$0xff]  ;;  %v260_v2 = vld [vmem:[%s405_s3 + $0x38] sm:$0xff]  ;;  %v16_v13 = vstv %s408_s6 }
   0x2   :  { %70 = vmatpush.bf16.msra.mxu0 %v252_v0  ;;  %v37_v3 = vld [vmem:[%s404_s0] sm:$0xff]  ;;  %v38_v4 = vld [vmem:[%s404_s0 + $0x8] sm:$0xff]  ;;  %149 = vmatpush.bf16.msra.mxu1 %v260_v2  ;;  %v259_v5 = vld [vmem:[%s405_s3 + $0x30] sm:$0xff]  ;;  %17 = vst [vmem:[#allocation2] sm:$0x1] %v16_v13 }
   0x3   :  { %v39_v6 = vpack.c.bf16 %v38_v4, %v37_v3  ;;  %v258_v7 = vld [vmem:[%s405_s3 + $0x28] sm:$0xff]  ;;  %v257_v8 = vld [vmem:[%s405_s3 + $0x20] sm:$0xff]  ;;  %v256_v9 = vld [vmem:[%s405_s3 + $0x18] sm:$0xff] }
   0x4   :  { %v255_v10 = vld [vmem:[%s405_s3 + $0x10] sm:$0xff]  ;;  %v254_v11 = vld [vmem:[%s405_s3 + $0x8] sm:$0xff]  ;;  %v253_v12 = vld [vmem:[%s405_s3] sm:$0xff] }
   0x5   :  { %v261_v14 = vld [vmem:[%s406_s2] ss:$0 sm:$0xff] }
   0x6   :  { %71 = vmatpush.bf16.msra.mxu0 %v251_v1  ;;  %150 = vmatpush.bf16.msra.mxu1 %v259_v5  ;;  %v262_v17 = vld [vmem:[%s407_s5] ss:$0 sm:$0xff] }
   0x7   :  { %v191_v26 = vld [vmem:[%s410_s8] sm:$0xff] }
   0x8   :  { %v264_v36 = vld [vmem:[%s409_s4] ss:$0 sm:$0xff] }
   0x9   :  { %216 = vmatmul.msk.bf16.vlgmr.msra.gmra.mxu0 %vm60_vm0, %v39_v6  ;;  %v263_v25 = vld [vmem:[#allocation2] ss:$0 sm:$0xff] }
   0xa   :  { %151 = vmatpush.bf16.msra.mxu1 %v258_v7  ;;  %v165_v39 = vld [vmem:[%s412_s7] sm:$0xff] }
   0xe   :  { %152 = vmatpush.bf16.msra.mxu1 %v257_v8 }
  0x12   :  { %153 = vmatpush.bf16.msra.mxu1 %v256_v9 }
  0x16   :  { %154 = vmatpush.bf16.msra.mxu1 %v255_v10 }
  0x1a   :  { %155 = vmatpush.bf16.msra.mxu1 %v254_v11 }
  0x1e   :  { %156 = vmatpush.bf16.msra.mxu1 %v253_v12 }
  0x86   :  { %v73_v15 = vpop.f32.mrf.mxu0 }
  0x87   :  { %v74_v16 = vadd.f32 %v261_v14, %v73_v15 }
  0x89   :  { %265 = vtanh.f32 %v74_v16 }
  0x8e   :  { %v75_v18 = vpop.f32.mrf.mxu0 }
  0x8f   :  { %v266_v19 = vpop.eup %265  ;;  %v76_v20 = vadd.f32 %v261_v14, %v75_v18 }
  0x90   :  { %v179_v21 = vmul.f32 %v266_v19, %v262_v17 }
  0x91   :  { %267 = vtanh.f32 %v76_v20 }
  0x92   :  { %181 = vadd.xlane.f32.xlu0 %v179_v21 }
  0x97   :  { %v268_v22 = vpop.eup %267 }
  0x98   :  { %v180_v23 = vmul.f32 %v268_v22, %v262_v17  ;;  %v80_v24 = vpack.c.bf16 %v268_v22, %v266_v19 }
  0x9a   :  { %183 = vadd.xlane.f32.xlu0 %v180_v23  ;;  %157 = vmatmul.bf16.vlgmr.msra.gmra.mxu1 %v80_v24 }
 0x105   :  { %v182_v27 = vpop.xlane.xlu0 %181 }
 0x106   :  { %v189_v28 = vadd.f32 %v263_v25, %v182_v27 }
 0x108   :  { %v193_v29 = vadd.f32 %v191_v26, %v189_v28 }
 0x10a   :  { %v195_v30 = vmax.f32 %v193_v29, 0.0 }
 0x10c   :  { %198 = vst.msk [vmem:[%s411_s10] sm:$0xff] %vm197_vm1, %v195_v30 }
 0x10d   :  { %v184_v32 = vpop.xlane.xlu0 %183 }
 0x10e   :  { %v190_v33 = vadd.f32 %v263_v25, %v184_v32 }
 0x113   :  { %v192_v31 = vld [vmem:[%s410_s8 + $0x8] sm:$0xff] }
 0x114   :  { %v194_v34 = vadd.f32 %v192_v31, %v190_v33 }
 0x116   :  { %v196_v35 = vmax.f32 %v194_v34, 0.0 }
 0x117   :  { %v158_v37 = vpop.f32.mrf.mxu1 }
 0x118   :  { %199 = vst.msk [vmem:[%s411_s10 + $0x8] sm:$0xff] %vm197_vm1, %v196_v35  ;;  %v159_v38 = vadd.f32 %v264_v36, %v158_v37 }
 0x11a   :  { %269 = vtanh.f32 %v159_v38 }
 0x11f   :  { %v160_v40 = vpop.f32.mrf.mxu1 }
 0x120   :  { %v270_v41 = vpop.eup %269  ;;  %v161_v42 = vadd.f32 %v264_v36, %v160_v40 }
 0x121   :  { %v167_v43 = vadd.f32 %v270_v41, %v165_v39 }
 0x122   :  { %271 = vtanh.f32 %v161_v42 }
 0x123   :  { %v249_v44 = vclamps-f32 %v167_v43, 1.0 }
 0x125   :  { %173 = vst.msk [vmem:[%s413_s9] sm:$0xff] %vm60_vm0, %v249_v44 }
 0x128   :  { %v272_v46 = vpop.eup %271 }
 0x12c   :  { %v166_v45 = vld [vmem:[%s412_s7 + $0x8] sm:$0xff] }
 0x12d   :  { %v168_v47 = vadd.f32 %v272_v46, %v166_v45 }
 0x12f   :  { %v250_v48 = vclamps-f32 %v168_v47, 1.0 }
 0x131   :  { %174 = vst.msk [vmem:[%s413_s9 + $0x8] sm:$0xff] %vm60_vm0, %v250_v48 }

// kernel: tpu_custom_call.1
= control target key start
LH: loop header
LB: loop body
LE: loop exit
PB: predicated region body
PF: predicated region fallthrough
CT: control target
= control target key end

     0   :  { %vm60_vm0 = vcmask 261120   ;;  %vm197_vm1 = vcmask 7168   ;;  %s403_s1 = inlined_call_operand.vmem [shape: bf16[32,128], index: 1, kind: input, shape index: {}]   ;;  %s404_s0 = inlined_call_operand.vmem [shape: f32[16,32], index: 0, kind: input, shape index: {}]   ;;  %s405_s3 = inlined_call_operand.vmem [shape: bf16[128,32], index: 3, kind: input, shape index: {}]   ;;  %s406_s2 = inlined_call_operand.vmem [shape: f32[1,128], index: 2, kind: input, shape index: {}]   ;;  %s407_s5 = inlined_call_operand.vmem [shape: f32[1,128], index: 5, kind: input, shape index: {}]   ;;  %s408_s6 = inlined_call_operand.<no memory space> [shape: f32[1,1], index: 6, kind: input, shape index: {}]   ;;  %s409_s4 = inlined_call_operand.vmem [shape: f32[1,32], index: 4, kind: input, shape index: {}]   ;;  %s410_s8 = inlined_call_operand.vmem [shape: f32[16,1], index: 8, kind: input, shape index: {}, may-alias: {8,10}]   ;;  %s411_s10 = inlined_call_operand.vmem [shape: f32[16,1], index: 10, kind: output, shape index: {1}, may-alias: {8,10}]   ;;  %s412_s7 = inlined_call_operand.vmem [shape: f32[16,32], index: 7, kind: input, shape index: {}, may-alias: {7,9}]   ;;  %s413_s9 = inlined_call_operand.vmem [shape: f32[16,32], index: 9, kind: output, shape index: {0}, may-alias: {7,9}]  }
   0x1   :  { %v252_v0 = vld [vmem:[%s403_s1 + $0x8] sm:$0xff]  ;;  %v251_v1 = vld [vmem:[%s403_s1] sm:$0xff]  ;;  %v260_v2 = vld [vmem:[%s405_s3 + $0x38] sm:$0xff]  ;;  %v16_v13 = vstv %s408_s6 }
   0x2   :  { %70 = vmatpush.bf16.msra.mxu0 %v252_v0  ;;  %v37_v3 = vld [vmem:[%s404_s0] sm:$0xff]  ;;  %v38_v4 = vld [vmem:[%s404_s0 + $0x8] sm:$0xff]  ;;  %149 = vmatpush.bf16.msra.mxu1 %v260_v2  ;;  %v259_v5 = vld [vmem:[%s405_s3 + $0x30] sm:$0xff]  ;;  %17 = vst [vmem:[#allocation2] sm:$0x1] %v16_v13 }
   0x3   :  { %v39_v6 = vpack.c.bf16 %v38_v4, %v37_v3  ;;  %v258_v7 = vld [vmem:[%s405_s3 + $0x28] sm:$0xff]  ;;  %v257_v8 = vld [vmem:[%s405_s3 + $0x20] sm:$0xff]  ;;  %v256_v9 = vld [vmem:[%s405_s3 + $0x18] sm:$0xff] }
   0x4   :  { %v255_v10 = vld [vmem:[%s405_s3 + $0x10] sm:$0xff]  ;;  %v254_v11 = vld [vmem:[%s405_s3 + $0x8] sm:$0xff]  ;;  %v253_v12 = vld [vmem:[%s405_s3] sm:$0xff] }
   0x5   :  { %v261_v14 = vld [vmem:[%s406_s2] ss:$0 sm:$0xff] }
   0x6   :  { %71 = vmatpush.bf16.msra.mxu0 %v251_v1  ;;  %150 = vmatpush.bf16.msra.mxu1 %v259_v5  ;;  %v262_v17 = vld [vmem:[%s407_s5] ss:$0 sm:$0xff] }
   0x7   :  { %v191_v26 = vld [vmem:[%s410_s8] sm:$0xff] }
   0x8   :  { %v264_v36 = vld [vmem:[%s409_s4] ss:$0 sm:$0xff] }
   0x9   :  { %216 = vmatmul.msk.bf16.vlgmr.msra.gmra.mxu0 %vm60_vm0, %v39_v6  ;;  %v263_v25 = vld [vmem:[#allocation2] ss:$0 sm:$0xff] }
   0xa   :  { %151 = vmatpush.bf16.msra.mxu1 %v258_v7  ;;  %v165_v39 = vld [vmem:[%s412_s7] sm:$0xff] }
   0xe   :  { %152 = vmatpush.bf16.msra.mxu1 %v257_v8 }
  0x12   :  { %153 = vmatpush.bf16.msra.mxu1 %v256_v9 }
  0x16   :  { %154 = vmatpush.bf16.msra.mxu1 %v255_v10 }
  0x1a   :  { %155 = vmatpush.bf16.msra.mxu1 %v254_v11 }
  0x1e   :  { %156 = vmatpush.bf16.msra.mxu1 %v253_v12 }
  0x86   :  { %v73_v15 = vpop.f32.mrf.mxu0 }
  0x87   :  { %v74_v16 = vadd.f32 %v261_v14, %v73_v15 }
  0x89   :  { %265 = vtanh.f32 %v74_v16 }
  0x8e   :  { %v75_v18 = vpop.f32.mrf.mxu0 }
  0x8f   :  { %v266_v19 = vpop.eup %265  ;;  %v76_v20 = vadd.f32 %v261_v14, %v75_v18 }
  0x90   :  { %v179_v21 = vmul.f32 %v266_v19, %v262_v17 }
  0x91   :  { %267 = vtanh.f32 %v76_v20 }
  0x92   :  { %181 = vadd.xlane.f32.xlu0 %v179_v21 }
  0x97   :  { %v268_v22 = vpop.eup %267 }
  0x98   :  { %v180_v23 = vmul.f32 %v268_v22, %v262_v17  ;;  %v80_v24 = vpack.c.bf16 %v268_v22, %v266_v19 }
  0x9a   :  { %183 = vadd.xlane.f32.xlu0 %v180_v23  ;;  %157 = vmatmul.bf16.vlgmr.msra.gmra.mxu1 %v80_v24 }
 0x105   :  { %v182_v27 = vpop.xlane.xlu0 %181 }
 0x106   :  { %v189_v28 = vadd.f32 %v263_v25, %v182_v27 }
 0x108   :  { %v193_v29 = vadd.f32 %v191_v26, %v189_v28 }
 0x10a   :  { %v195_v30 = vmax.f32 %v193_v29, 0.0 }
 0x10c   :  { %198 = vst.msk [vmem:[%s411_s10] sm:$0xff] %vm197_vm1, %v195_v30 }
 0x10d   :  { %v184_v32 = vpop.xlane.xlu0 %183 }
 0x10e   :  { %v190_v33 = vadd.f32 %v263_v25, %v184_v32 }
 0x113   :  { %v192_v31 = vld [vmem:[%s410_s8 + $0x8] sm:$0xff] }
 0x114   :  { %v194_v34 = vadd.f32 %v192_v31, %v190_v33 }
 0x116   :  { %v196_v35 = vmax.f32 %v194_v34, 0.0 }
 0x117   :  { %v158_v37 = vpop.f32.mrf.mxu1 }
 0x118   :  { %199 = vst.msk [vmem:[%s411_s10 + $0x8] sm:$0xff] %vm197_vm1, %v196_v35  ;;  %v159_v38 = vadd.f32 %v264_v36, %v158_v37 }
 0x11a   :  { %269 = vtanh.f32 %v159_v38 }
 0x11f   :  { %v160_v40 = vpop.f32.mrf.mxu1 }
 0x120   :  { %v270_v41 = vpop.eup %269  ;;  %v161_v42 = vadd.f32 %v264_v36, %v160_v40 }
 0x121   :  { %v167_v43 = vadd.f32 %v270_v41, %v165_v39 }
 0x122   :  { %271 = vtanh.f32 %v161_v42 }
 0x123   :  { %v249_v44 = vclamps-f32 %v167_v43, 1.0 }
 0x125   :  { %173 = vst.msk [vmem:[%s413_s9] sm:$0xff] %vm60_vm0, %v249_v44 }
 0x128   :  { %v272_v46 = vpop.eup %271 }
 0x12c   :  { %v166_v45 = vld [vmem:[%s412_s7 + $0x8] sm:$0xff] }
 0x12d   :  { %v168_v47 = vadd.f32 %v272_v46, %v166_v45 }
 0x12f   :  { %v250_v48 = vclamps-f32 %v168_v47, 1.0 }
 0x131   :  { %174 = vst.msk [vmem:[%s413_s9 + $0x8] sm:$0xff] %vm60_vm0, %v250_v48 }

</bundles_post_ra>
